<compile_context>
chip_gen: v6e
topology: v6e:2x2x1
jax: 0.10.0
libtpu: 0.0.40
codegen_flags: <defaults>
</compile_context>

<pallas_src>
import functools
import math

import jax
import jax.numpy as jnp
from jax.experimental import pallas as pl
from jax.experimental.pallas import tpu as pltpu

_INV_SQRT2 = 1.0 / math.sqrt(2.0)


def _gelu_exact(x):
    # PyTorch nn.GELU() default (erf).  Used by the f32 reference only; the
    # kernel uses the tanh approximation (EUP-routed) within the stated tolerance.
    return 0.5 * x * (1.0 + jax.lax.erf(x * _INV_SQRT2))


def _action_decoder_kernel(x_ref, g_ref, beta_ref,
                           w1_ref, b1_ref, w2_ref, b2_ref, w3_ref, b3_ref,
                           o_ref, *, T, eps):
    x = x_ref[...].astype(jnp.float32)                       # [tm, D_in]
    d_in = x.shape[-1]

    # --- LayerNorm over last dim: single pass for both statistics.
    # Clamp the variance: E[x^2]-E[x]^2 can go slightly negative under
    # catastrophic cancellation when |mean| >> std.
    inv_d = 1.0 / d_in
    s1 = jnp.sum(x, axis=-1, keepdims=True)
    s2 = jnp.sum(x * x, axis=-1, keepdims=True)
    mean = s1 * inv_d
    var = jnp.maximum(s2 * inv_d - mean * mean, 0.0)
    src = (x - mean) * jax.lax.rsqrt(var + eps) * g_ref[...] + beta_ref[...]

    # --- act_decoder_pre: Linear -> GELU -> (Dropout: identity) -> Linear -> GELU
    # bf16 MXU operands, f32 accumulation.  tanh-approx GELU puts the
    # transcendental on the EUP slot (VALU is the saturating slot at these
    # feature sizes); elementwise math stays f32 (no bf16 VPU on v5e).
    h = jnp.dot(src.astype(jnp.bfloat16), w1_ref[...],
                preferred_element_type=jnp.float32) + b1_ref[...]
    h = jax.nn.gelu(h, approximate=True)
    y = jnp.dot(h.astype(jnp.bfloat16), w2_ref[...],
                preferred_element_type=jnp.float32) + b2_ref[...]
    y = jax.nn.gelu(y, approximate=True)

    # --- residual + act_decoder_post ---
    z = jnp.dot((y + src).astype(jnp.bfloat16), w3_ref[...],
                preferred_element_type=jnp.float32) + b3_ref[...]

    # --- softmax(z / T) along last dim (numerically stable) ---
    z = z * (1.0 / T)
    z = z - jnp.max(z, axis=-1, keepdims=True)
    e = jnp.exp(z)
    denom = jnp.sum(e, axis=-1, keepdims=True)                # >= 1, safe
    r = pl.reciprocal(denom, approx=True)                     # EUP vrcp
    r = r * (2.0 - denom * r)                                 # Newton step -> ~f32 exact
    # TODO(synk): D_out<128 output still lowers to masked stores; a lane-dense
    # packed output would need an in-kernel sublane->lane relayout whose XLU
    # cost likely exceeds the store savings at these tiny feature sizes.
    o_ref[...] = (e * r).astype(o_ref.dtype)


def _round_up(a, b):
    return (a + b - 1) // b * b


@functools.lru_cache(maxsize=1)
def _vmem_limit_bytes():
    # Re-derive the VMEM budget per generation instead of a fixed 32 MiB:
    # ~40 MiB on v7x (64 MiB physical VMEM), ~80 MiB on v5e/v6e (128 MiB).
    try:
        cap = pltpu.get_tpu_info().vmem_capacity_bytes
    except Exception:
        cap = 64 * 1024 * 1024
    return int(min(96 * 1024 * 1024, max(32 * 1024 * 1024, cap * 5 // 8)))


def prepare_params(params):
    """One-time bf16 cast of the matmul weights (hoisted out of the per-call path).

    Biases and LayerNorm affine parameters stay f32 (added after the MXU).
    """
    out = dict(params)
    for k in ("w1", "w2", "w3"):
        out[k] = jnp.asarray(params[k], jnp.bfloat16)
    return out


def _const_spec(shape):
    # Constant-index operand: DMA'd once -> a single VMEM buffer is enough.
    try:
        return pl.BlockSpec(shape, lambda i: (0, 0), pipeline_mode=pl.Buffered(1))
    except TypeError:  # older JAX without pipeline_mode / Buffered
        return pl.BlockSpec(shape, lambda i: (0, 0))


@functools.partial(jax.jit, static_argnames=("T", "tm"))
def action_decoder_forward(x, params, *, T=1.0, tm=1024):
    """x: [..., D_in]. Returns softmax probs [..., D_out]."""
    orig_shape = x.shape
    D_in = orig_shape[-1]
    x2 = x.reshape(-1, D_in)                    # glue reshape in plain JAX
    N = x2.shape[0]

    hidden = params["w1"].shape[1]
    D_out = params["w3"].shape[1]

    # Large row tile amortizes the ~0.35us/step overhead and enlarges DMA
    # bursts ([tm, D_in] f32 is only tm*4*D_in bytes at these widths).  Also
    # keep at least 2 grid steps whenever possible so the "parallel" axis can
    # shard across v7x's 2 TensorCores; on single-TC v5e/v6e this costs at
    # most one extra grid step.
    if N > 8:
        tm = min(tm, _round_up((N + 1) // 2, 8))
    tm = max(8, min(tm, _round_up(N, 8)))
    N_pad = _round_up(N, tm)
    if N_pad != N:
        x2 = jnp.pad(x2, ((0, N_pad - N), (0, 0)))

    # Weights ideally arrive pre-cast (prepare_params); cast only if needed so
    # there is no per-call HBM round-trip on the weights.
    def _bf16(w):
        return w if w.dtype == jnp.bfloat16 else w.astype(jnp.bfloat16)
    w1, w2, w3 = _bf16(params["w1"]), _bf16(params["w2"]), _bf16(params["w3"])

    kernel = functools.partial(_action_decoder_kernel, T=float(T), eps=1e-5)

    row_in = pl.BlockSpec((tm, D_in), lambda i: (i, 0))
    row_out = pl.BlockSpec((tm, D_out), lambda i: (i, 0))

    out = pl.pallas_call(
        kernel,
        out_shape=jax.ShapeDtypeStruct((N_pad, D_out), x.dtype),
        grid_spec=pltpu.PrefetchScalarGridSpec(
            num_scalar_prefetch=0,
            grid=(N_pad // tm,),
            in_specs=[
                row_in,                          # x rows
                _const_spec((1, D_in)),          # layernorm gamma
                _const_spec((1, D_in)),          # layernorm beta
                _const_spec((D_in, hidden)),     # w1 (bf16)
                _const_spec((1, hidden)),        # b1
                _const_spec((hidden, D_in)),     # w2 (bf16)
                _const_spec((1, D_in)),          # b2
                _const_spec((D_in, D_out)),      # w3 (bf16)
                _const_spec((1, D_out)),         # b3
            ],
            out_specs=row_out,
        ),
        compiler_params=pltpu.CompilerParams(
            dimension_semantics=("parallel",),   # megacore / v7x 2-TC sharding
            vmem_limit_bytes=_vmem_limit_bytes(),
        ),
    )(x2, params["gamma"], params["beta"],
      w1, params["b1"], w2, params["b2"], w3, params["b3"])

    return out[:N].reshape(*orig_shape[:-1], D_out)


def init_params(key, input_size, hidden_size, output_size):
    ks = jax.random.split(key, 6)

    def lin(kw, kb, fan_in, fan_out):
        bound = 1.0 / math.sqrt(fan_in)
        w = jax.random.uniform(kw, (fan_in, fan_out), jnp.float32, -bound, bound)
        b = jax.random.uniform(kb, (1, fan_out), jnp.float32, -bound, bound)
        return w, b

    w1, b1 = lin(ks[0], ks[1], input_size, hidden_size)
    w2, b2 = lin(ks[2], ks[3], hidden_size, input_size)
    w3, b3 = lin(ks[4], ks[5], input_size, output_size)
    return {
        "gamma": jnp.ones((1, input_size), jnp.float32),
        "beta": jnp.zeros((1, input_size), jnp.float32),
        "w1": w1, "b1": b1, "w2": w2, "b2": b2, "w3": w3, "b3": b3,
    }


def reference_forward(x, p, T=1.0):
    # Pure f32 reference matching the PyTorch module (exact erf GELU).
    mean = jnp.mean(x, axis=-1, keepdims=True)
    var = jnp.mean((x - mean) ** 2, axis=-1, keepdims=True)
    src = (x - mean) / jnp.sqrt(var + 1e-5) * p["gamma"] + p["beta"]
    h = _gelu_exact(src @ p["w1"] + p["b1"])
    y = _gelu_exact(h @ p["w2"] + p["b2"])
    z = (y + src) @ p["w3"] + p["b3"]
    return jax.nn.softmax(z / T, axis=-1)


if __name__ == "__main__":
    key = jax.random.PRNGKey(0)
    k_x, k_x2, k_p = jax.random.split(key, 3)

    batch, seq = 2, 8
    input_size, hidden_size, output_size = 32, 64, 16

    params = init_params(k_p, input_size, hidden_size, output_size)
    fast_params = prepare_params(params)     # one-time bf16 weight cast

    # main case
    x = jax.random.normal(k_x, (batch, seq, input_size), jnp.float32)
    out = action_decoder_forward(x, fast_params, T=1.0)
    jax.block_until_ready(out)

    ref = reference_forward(x.reshape(-1, input_size), params, T=1.0)
    ref = ref.reshape(batch, seq, output_size)
    # bf16 matmul operands + tanh GELU + approx/Newton reciprocal -> compare
    # with a loose tolerance against the f32/erf reference; softmax rows must
    # still sum to 1 in f32.
    assert jnp.allclose(out, ref, atol=2e-2), "mismatch vs reference"
    assert jnp.allclose(jnp.sum(out, axis=-1), 1.0, atol=1e-5), "softmax rows must sum to 1"

    # second case: N not a multiple of 8 -> exercises the pad/slice path
    x_odd = jax.random.normal(k_x2, (3, 7, input_size), jnp.float32)
    out_odd = action_decoder_forward(x_odd, fast_params, T=2.0)
    jax.block_until_ready(out_odd)
    ref_odd = reference_forward(x_odd.reshape(-1, input_size), params, T=2.0)
    ref_odd = ref_odd.reshape(3, 7, output_size)
    assert jnp.allclose(out_odd, ref_odd, atol=2e-2), "mismatch vs reference (padded case)"
    assert jnp.allclose(jnp.sum(out_odd, axis=-1), 1.0, atol=1e-5), "softmax rows must sum to 1"

    print("KERNEL_OK")
</pallas_src>

<mosaic_0001>
module attributes {stable_mosaic.version = 11 : i64} {
  func.func @_action_decoder_kernel(%arg0: i32, %arg1: memref<8x32xf32, #tpu.memory_space<vmem>>, %arg2: memref<1x32xf32, #tpu.memory_space<vmem>>, %arg3: memref<1x32xf32, #tpu.memory_space<vmem>>, %arg4: memref<32x64xbf16, #tpu.memory_space<vmem>>, %arg5: memref<1x64xf32, #tpu.memory_space<vmem>>, %arg6: memref<64x32xbf16, #tpu.memory_space<vmem>>, %arg7: memref<1x32xf32, #tpu.memory_space<vmem>>, %arg8: memref<32x16xbf16, #tpu.memory_space<vmem>>, %arg9: memref<1x16xf32, #tpu.memory_space<vmem>>, %arg10: memref<8x16xf32, #tpu.memory_space<vmem>>) attributes {dimension_semantics = [#tpu.dimension_semantics<parallel>], iteration_bounds = array<i64: 2>, scalar_prefetch = 0 : i64, scratch_operands = 0 : i64, tpu.core_type = #tpu.core_type<tc>, window_params = [{transform_indices = @transform_0, window_bounds = array<i64: 8, 32>}, {pipeline_mode = #tpu.pipeline_mode<synchronous>, transform_indices = @transform_1, window_bounds = array<i64: 1, 32>}, {pipeline_mode = #tpu.pipeline_mode<synchronous>, transform_indices = @transform_2, window_bounds = array<i64: 1, 32>}, {pipeline_mode = #tpu.pipeline_mode<synchronous>, transform_indices = @transform_3, window_bounds = array<i64: 32, 64>}, {pipeline_mode = #tpu.pipeline_mode<synchronous>, transform_indices = @transform_4, window_bounds = array<i64: 1, 64>}, {pipeline_mode = #tpu.pipeline_mode<synchronous>, transform_indices = @transform_5, window_bounds = array<i64: 64, 32>}, {pipeline_mode = #tpu.pipeline_mode<synchronous>, transform_indices = @transform_6, window_bounds = array<i64: 1, 32>}, {pipeline_mode = #tpu.pipeline_mode<synchronous>, transform_indices = @transform_7, window_bounds = array<i64: 32, 16>}, {pipeline_mode = #tpu.pipeline_mode<synchronous>, transform_indices = @transform_8, window_bounds = array<i64: 1, 16>}, {transform_indices = @transform_9, window_bounds = array<i64: 8, 16>}]} {
    %c0 = arith.constant 0 : index
    %c0_0 = arith.constant 0 : index
    %0 = vector.load %arg1[%c0, %c0_0] : memref<8x32xf32, #tpu.memory_space<vmem>>, vector<8x32xf32>
    %cst = arith.constant dense<0.000000e+00> : vector<8xf32>
    %1 = vector.multi_reduction <add>, %0, %cst [1] : vector<8x32xf32> to vector<8xf32>
    %2 = vector.shape_cast %1 : vector<8xf32> to vector<8x1xf32>
    %3 = arith.mulf %0, %0 : vector<8x32xf32>
    %cst_1 = arith.constant dense<0.000000e+00> : vector<8xf32>
    %4 = vector.multi_reduction <add>, %3, %cst_1 [1] : vector<8x32xf32> to vector<8xf32>
    %5 = vector.shape_cast %4 : vector<8xf32> to vector<8x1xf32>
    %cst_2 = arith.constant 3.125000e-02 : f32
    %6 = vector.broadcast %cst_2 : f32 to vector<8x1xf32>
    %7 = arith.mulf %2, %6 : vector<8x1xf32>
    %cst_3 = arith.constant 3.125000e-02 : f32
    %8 = vector.broadcast %cst_3 : f32 to vector<8x1xf32>
    %9 = arith.mulf %5, %8 : vector<8x1xf32>
    %10 = arith.mulf %7, %7 : vector<8x1xf32>
    %11 = arith.subf %9, %10 : vector<8x1xf32>
    %cst_4 = arith.constant 0.000000e+00 : f32
    %12 = vector.broadcast %cst_4 : f32 to vector<8x1xf32>
    %13 = arith.maximumf %11, %12 : vector<8x1xf32>
    %14 = vector.broadcast %7 : vector<8x1xf32> to vector<8x32xf32>
    %15 = arith.subf %0, %14 : vector<8x32xf32>
    %cst_5 = arith.constant 9.99999974E-6 : f32
    %16 = vector.broadcast %cst_5 : f32 to vector<8x1xf32>
    %17 = arith.addf %13, %16 : vector<8x1xf32>
    %18 = math.rsqrt %17 : vector<8x1xf32>
    %19 = vector.broadcast %18 : vector<8x1xf32> to vector<8x32xf32>
    %20 = arith.mulf %15, %19 : vector<8x32xf32>
    %c0_6 = arith.constant 0 : index
    %c0_7 = arith.constant 0 : index
    %21 = vector.load %arg2[%c0_6, %c0_7] : memref<1x32xf32, #tpu.memory_space<vmem>>, vector<1x32xf32>
    %22 = vector.broadcast %21 : vector<1x32xf32> to vector<8x32xf32>
    %23 = arith.mulf %20, %22 : vector<8x32xf32>
    %c0_8 = arith.constant 0 : index
    %c0_9 = arith.constant 0 : index
    %24 = vector.load %arg3[%c0_8, %c0_9] : memref<1x32xf32, #tpu.memory_space<vmem>>, vector<1x32xf32>
    %25 = vector.broadcast %24 : vector<1x32xf32> to vector<8x32xf32>
    %26 = arith.addf %23, %25 : vector<8x32xf32>
    %27 = arith.truncf %26 : vector<8x32xf32> to vector<8x32xbf16>
    %c0_10 = arith.constant 0 : index
    %c0_11 = arith.constant 0 : index
    %28 = vector.load %arg4[%c0_10, %c0_11] : memref<32x64xbf16, #tpu.memory_space<vmem>>, vector<32x64xbf16>
    %cst_12 = arith.constant dense<0.000000e+00> : vector<8x64xf32>
    %29 = tpu.matmul %27, %28, %cst_12 {dimension_numbers = #tpu.dot_dimension_numbers<[1], [0], [0], [1], [0, 0, 1, 1], [], []>} : vector<8x32xbf16>, vector<32x64xbf16>, vector<8x64xf32> -> vector<8x64xf32>
    %c0_13 = arith.constant 0 : index
    %c0_14 = arith.constant 0 : index
    %30 = vector.load %arg5[%c0_13, %c0_14] : memref<1x64xf32, #tpu.memory_space<vmem>>, vector<1x64xf32>
    %31 = vector.broadcast %30 : vector<1x64xf32> to vector<8x64xf32>
    %32 = arith.addf %29, %31 : vector<8x64xf32>
    %33 = arith.mulf %32, %32 : vector<8x64xf32>
    %34 = arith.mulf %32, %33 : vector<8x64xf32>
    %cst_15 = arith.constant 4.471500e-02 : f32
    %35 = vector.broadcast %cst_15 : f32 to vector<8x64xf32>
    %36 = arith.mulf %35, %34 : vector<8x64xf32>
    %37 = arith.addf %32, %36 : vector<8x64xf32>
    %cst_16 = arith.constant 0.797884583 : f32
    %38 = vector.broadcast %cst_16 : f32 to vector<8x64xf32>
    %39 = arith.mulf %38, %37 : vector<8x64xf32>
    %40 = math.tanh %39 : vector<8x64xf32>
    %cst_17 = arith.constant 1.000000e+00 : f32
    %41 = vector.broadcast %cst_17 : f32 to vector<8x64xf32>
    %42 = arith.addf %41, %40 : vector<8x64xf32>
    %cst_18 = arith.constant 5.000000e-01 : f32
    %43 = vector.broadcast %cst_18 : f32 to vector<8x64xf32>
    %44 = arith.mulf %43, %42 : vector<8x64xf32>
    %45 = arith.mulf %32, %44 : vector<8x64xf32>
    %46 = arith.truncf %45 : vector<8x64xf32> to vector<8x64xbf16>
    %c0_19 = arith.constant 0 : index
    %c0_20 = arith.constant 0 : index
    %47 = vector.load %arg6[%c0_19, %c0_20] : memref<64x32xbf16, #tpu.memory_space<vmem>>, vector<64x32xbf16>
    %cst_21 = arith.constant dense<0.000000e+00> : vector<8x32xf32>
    %48 = tpu.matmul %46, %47, %cst_21 {dimension_numbers = #tpu.dot_dimension_numbers<[1], [0], [0], [1], [0, 0, 1, 1], [], []>} : vector<8x64xbf16>, vector<64x32xbf16>, vector<8x32xf32> -> vector<8x32xf32>
    %c0_22 = arith.constant 0 : index
    %c0_23 = arith.constant 0 : index
    %49 = vector.load %arg7[%c0_22, %c0_23] : memref<1x32xf32, #tpu.memory_space<vmem>>, vector<1x32xf32>
    %50 = vector.broadcast %49 : vector<1x32xf32> to vector<8x32xf32>
    %51 = arith.addf %48, %50 : vector<8x32xf32>
    %52 = arith.mulf %51, %51 : vector<8x32xf32>
    %53 = arith.mulf %51, %52 : vector<8x32xf32>
    %cst_24 = arith.constant 4.471500e-02 : f32
    %54 = vector.broadcast %cst_24 : f32 to vector<8x32xf32>
    %55 = arith.mulf %54, %53 : vector<8x32xf32>
    %56 = arith.addf %51, %55 : vector<8x32xf32>
    %cst_25 = arith.constant 0.797884583 : f32
    %57 = vector.broadcast %cst_25 : f32 to vector<8x32xf32>
    %58 = arith.mulf %57, %56 : vector<8x32xf32>
    %59 = math.tanh %58 : vector<8x32xf32>
    %cst_26 = arith.constant 1.000000e+00 : f32
    %60 = vector.broadcast %cst_26 : f32 to vector<8x32xf32>
    %61 = arith.addf %60, %59 : vector<8x32xf32>
    %cst_27 = arith.constant 5.000000e-01 : f32
    %62 = vector.broadcast %cst_27 : f32 to vector<8x32xf32>
    %63 = arith.mulf %62, %61 : vector<8x32xf32>
    %64 = arith.mulf %51, %63 : vector<8x32xf32>
    %65 = arith.addf %64, %26 : vector<8x32xf32>
    %66 = arith.truncf %65 : vector<8x32xf32> to vector<8x32xbf16>
    %c0_28 = arith.constant 0 : index
    %c0_29 = arith.constant 0 : index
    %67 = vector.load %arg8[%c0_28, %c0_29] : memref<32x16xbf16, #tpu.memory_space<vmem>>, vector<32x16xbf16>
    %cst_30 = arith.constant dense<0.000000e+00> : vector<8x16xf32>
    %68 = tpu.matmul %66, %67, %cst_30 {dimension_numbers = #tpu.dot_dimension_numbers<[1], [0], [0], [1], [0, 0, 1, 1], [], []>} : vector<8x32xbf16>, vector<32x16xbf16>, vector<8x16xf32> -> vector<8x16xf32>
    %c0_31 = arith.constant 0 : index
    %c0_32 = arith.constant 0 : index
    %69 = vector.load %arg9[%c0_31, %c0_32] : memref<1x16xf32, #tpu.memory_space<vmem>>, vector<1x16xf32>
    %70 = vector.broadcast %69 : vector<1x16xf32> to vector<8x16xf32>
    %71 = arith.addf %68, %70 : vector<8x16xf32>
    %cst_33 = arith.constant 1.000000e+00 : f32
    %72 = vector.broadcast %cst_33 : f32 to vector<8x16xf32>
    %73 = arith.mulf %71, %72 : vector<8x16xf32>
    %cst_34 = arith.constant dense<0xFF800000> : vector<8xf32>
    %74 = vector.multi_reduction <maximumf>, %73, %cst_34 [1] : vector<8x16xf32> to vector<8xf32>
    %75 = vector.shape_cast %74 : vector<8xf32> to vector<8x1xf32>
    %76 = vector.broadcast %75 : vector<8x1xf32> to vector<8x16xf32>
    %77 = arith.subf %73, %76 : vector<8x16xf32>
    %78 = math.exp %77 : vector<8x16xf32>
    %cst_35 = arith.constant dense<0.000000e+00> : vector<8xf32>
    %79 = vector.multi_reduction <add>, %78, %cst_35 [1] : vector<8x16xf32> to vector<8xf32>
    %80 = vector.shape_cast %79 : vector<8xf32> to vector<8x1xf32>
    %81 = tpu.reciprocal %80 {approx = true} : vector<8x1xf32> -> vector<8x1xf32>
    %82 = arith.mulf %80, %81 : vector<8x1xf32>
    %cst_36 = arith.constant 2.000000e+00 : f32
    %83 = vector.broadcast %cst_36 : f32 to vector<8x1xf32>
    %84 = arith.subf %83, %82 : vector<8x1xf32>
    %85 = arith.mulf %81, %84 : vector<8x1xf32>
    %86 = vector.broadcast %85 : vector<8x1xf32> to vector<8x16xf32>
    %87 = arith.mulf %78, %86 : vector<8x16xf32>
    %c0_37 = arith.constant 0 : index
    %c0_38 = arith.constant 0 : index
    %88 = vector.load %arg10[%c0_37, %c0_38] : memref<8x16xf32, #tpu.memory_space<vmem>>, vector<8x16xf32>
    tpu.vector_store %arg10[%c0_37, %c0_38], %87 {strides = array<i32>} : memref<8x16xf32, #tpu.memory_space<vmem>>, vector<8x16xf32>,
    return
  }
  func.func @transform_0(%arg0: i32) -> (i32, i32) {
    %c0_i32 = arith.constant 0 : i32
    %c0_i32_0 = arith.constant 0 : i32
    return %arg0, %c0_i32 : i32, i32
  }
  func.func @transform_1(%arg0: i32) -> (i32, i32) {
    %c0_i32 = arith.constant 0 : i32
    %c0_i32_0 = arith.constant 0 : i32
    %c0_i32_1 = arith.constant 0 : i32
    return %c0_i32, %c0_i32_0 : i32, i32
  }
  func.func @transform_2(%arg0: i32) -> (i32, i32) {
    %c0_i32 = arith.constant 0 : i32
    %c0_i32_0 = arith.constant 0 : i32
    %c0_i32_1 = arith.constant 0 : i32
    return %c0_i32, %c0_i32_0 : i32, i32
  }
  func.func @transform_3(%arg0: i32) -> (i32, i32) {
    %c0_i32 = arith.constant 0 : i32
    %c0_i32_0 = arith.constant 0 : i32
    %c0_i32_1 = arith.constant 0 : i32
    return %c0_i32, %c0_i32_0 : i32, i32
  }
  func.func @transform_4(%arg0: i32) -> (i32, i32) {
    %c0_i32 = arith.constant 0 : i32
    %c0_i32_0 = arith.constant 0 : i32
    %c0_i32_1 = arith.constant 0 : i32
    return %c0_i32, %c0_i32_0 : i32, i32
  }
  func.func @transform_5(%arg0: i32) -> (i32, i32) {
    %c0_i32 = arith.constant 0 : i32
    %c0_i32_0 = arith.constant 0 : i32
    %c0_i32_1 = arith.constant 0 : i32
    return %c0_i32, %c0_i32_0 : i32, i32
  }
  func.func @transform_6(%arg0: i32) -> (i32, i32) {
    %c0_i32 = arith.constant 0 : i32
    %c0_i32_0 = arith.constant 0 : i32
    %c0_i32_1 = arith.constant 0 : i32
    return %c0_i32, %c0_i32_0 : i32, i32
  }
  func.func @transform_7(%arg0: i32) -> (i32, i32) {
    %c0_i32 = arith.constant 0 : i32
    %c0_i32_0 = arith.constant 0 : i32
    %c0_i32_1 = arith.constant 0 : i32
    return %c0_i32, %c0_i32_0 : i32, i32
  }
  func.func @transform_8(%arg0: i32) -> (i32, i32) {
    %c0_i32 = arith.constant 0 : i32
    %c0_i32_0 = arith.constant 0 : i32
    %c0_i32_1 = arith.constant 0 : i32
    return %c0_i32, %c0_i32_0 : i32, i32
  }
  func.func @transform_9(%arg0: i32) -> (i32, i32) {
    %c0_i32 = arith.constant 0 : i32
    %c0_i32_0 = arith.constant 0 : i32
    return %arg0, %c0_i32 : i32, i32
  }
}

</mosaic_0001>

<bundles_post_ra>
// kernel: action_decoder_forward.1
= control target key start
LH: loop header
LB: loop body
LE: loop exit
PB: predicated region body
PF: predicated region fallthrough
CT: control target
= control target key end

     0   :  { %14 = vsyncpa [#allocation3], 0  ;;  %s1064_s0 = inlined_call_operand.vmem [shape: f32[16,32], index: 0, kind: input, shape index: {}]   ;;  %s1065_s1 = inlined_call_operand.vmem [shape: f32[1,32], index: 1, kind: input, shape index: {}]   ;;  %s1066_s2 = inlined_call_operand.vmem [shape: f32[1,32], index: 2, kind: input, shape index: {}]   ;;  %s1067_s3 = inlined_call_operand.vmem [shape: bf16[32,64], index: 3, kind: input, shape index: {}]   ;;  %s1068_s4 = inlined_call_operand.vmem [shape: f32[1,64], index: 4, kind: input, shape index: {}]   ;;  %s1069_s5 = inlined_call_operand.vmem [shape: bf16[64,32], index: 5, kind: input, shape index: {}]   ;;  %s1070_s6 = inlined_call_operand.vmem [shape: f32[1,32], index: 6, kind: input, shape index: {}]   ;;  %s1071_s7 = inlined_call_operand.vmem [shape: bf16[32,16], index: 7, kind: input, shape index: {}]   ;;  %s1072_s8 = inlined_call_operand.vmem [shape: f32[1,16], index: 8, kind: input, shape index: {}]   ;;  %s1073_s9 = inlined_call_operand.hbm [shape: f32[16,16], index: 9, kind: output, shape index: {}]  }
   0x1   :  { %16 = vsyncpa [#allocation3 + $0x1], 0  ;;  %s928_s30 = smov 0   ;;  %s930_s10 = smov 0  }
   0x2   :  { %s932_s11 = smov 0   ;;  %s934_s12 = smov 0  }
   0x3 LB: > { %s949_s13 = sadd.s32 4294967295, %s873_s12   ;;  %s689_s14 = sadd.s32 4294967294, %s873_s12   ;;  %s873_s12 = sphi %s934_s12, %s1079_s12   ;;  %s869_s11 = sphi %s932_s11, %s1078_s11   ;;  %s865_s10 = sphi %s930_s10, %s1077_s10   ;;  %s861_s30 = sphi %s928_s30, %s1076_s30  }
   0x4   : > { %s953_s15 = sadd.s32 1, %s873_s12   ;;  %s223_s16 = sadd.s32 1, %s869_s11 }
   0x5   : > { %s220_s17 = ssub.s32 %s873_s12, %s953_s15  ;;  %p233_p0 = scmp.ne.s32.totalorder %s869_s11, %s865_s10 }
   0x6   : > { %p221_p1 = scmp.eq.s32.totalorder %s220_s17, 0  ;;  %p234_p2 = scmp.eq.s32.totalorder %s949_s13, 1 }
   0x7   : > { %p239_p3 = scmp.ne.s32.totalorder %s865_s10, %s861_s30  ;;  %p240_p4 = scmp.eq.s32.totalorder %s689_s14, 1 }
   0x8   : > { %s964_s18 = scalar_select %p221_p1, %s869_s11, %s223_s16  }
   0x9   : > { %p966_p5 = por %p234_p2, %p233_p0  ;;  %p970_p6 = por %p240_p4, %p239_p3 }
   0xa   : > { %p692_p7 = scmp.ge.s32.totalorder %s873_s12, 1  ;;  %p289_p8 = scmp.lt.s32.totalorder %s873_s12, 3 }
   0xc   : > { %p290_p9 = pnand %p692_p7, %p289_p8 }
   0xd   : > { %p324_p10 = scmp.lt.s32.totalorder (!%p290_p9), %s949_s13, 1  ;;  %s321_s28 = sand.u32 (!%p290_p9), 1, %s865_s10  }
   0xe   : > { %293 = sbr.rel (%p290_p9) target bundleno = 1179 (0x49b), region = 56  ;;  %s693_s29 = sshll.u32 (!%p290_p9), %s321_s28, 3 }
   0xf   : > { %s712_s14 = sshll.u32 (!%p290_p9), %s949_s13, 7  ;;  %s323_s16 = scalar_lea.vmem (!%p290_p9), [#allocation2], %s693_s29 }
  0x10   : > { %s630_s17 = sshll.u32 (!%p290_p9), %s323_s16, 4  ;;  %s628_s23 = scalar_lea.hbm (!%p290_p9), %s1073_s9, %s712_s14  ;;  %s631_s17 = int_to_ptr.vmem [resolvable:$true] %s630_s17 }
  0x11   : > { %s617_s24 = scalar_lea.sflag (!%p290_p9), [#allocation3], %s321_s28  ;;  %s877_s26 = smov (!%p290_p9), [#allocation2]  }
  0x12   : > { %s817_s27 = sshll.u32 (!%p290_p9), %s877_s26, 4  ;;  %s818_s27 = int_to_ptr.vmem [resolvable:$false] %s817_s27 }
  0x13   : > { %s325_s21 = scalar_select %p324_p10, %s949_s13, 1  ;;  %vm330_vm0 = vcmask 261120   ;;  %v795_v4 = vld [vmem:[%s1067_s3 + $0x8] sm:$0xff]   ;;  %v875_v5 = vmov 0.0   ;;  %vm876_vm1 = vmmov 0   ;;  %v796_v6 = vld [vmem:[%s1067_s3] sm:$0xff]  }
  0x14   : > { %726 = vmatprep.subr.bf16.mxu0 %v875_v5  ;;  %730 = vmatprep.mubr.msk.bf16.mxu0 %vm876_vm1, %v875_v5  ;;  %v695_v17 = vld [vmem:[%s1065_s1] ss:$0 sm:$0xff]  ;;  %v797_v23 = vld [vmem:[%s1069_s5 + $0x18] sm:$0xff]   ;;  %v798_v24 = vld [vmem:[%s1069_s5 + $0x10] sm:$0xff]   ;;  %vm479_vm2 = vcmask 523264   ;;  %vm600_vm3 = vcmask 130048   ;;  %p820_p0 = scmp.lt.s32.totalorder %s631_s17, %s818_s27 }
  0x15   : > { %s694_s22 = sshll.u32 %s325_s21, 3  ;;  %727 = vmatpush3.bf16.msra.mxu0 %v795_v4  ;;  %734 = vmatprep.subr.bf16.mxu1 %v875_v5  ;;  %v696_v19 = vld [vmem:[%s1066_s2] ss:$0 sm:$0xff]  ;;  %v799_v25 = vld [vmem:[%s1069_s5 + $0x8] sm:$0xff]   ;;  %s819_s13 = scalar_lea.vmem %s818_s27, 256 }
  0x16   : > { %s327_s25 = scalar_lea.vmem %s1064_s0, %s694_s22  ;;  %728 = vmatprep.subr.bf16.mxu0 %v875_v5  ;;  %742 = vmatprep.mubr.msk.bf16.mxu1 %vm876_vm1, %v875_v5  ;;  %v800_v26 = vld [vmem:[%s1069_s5] sm:$0xff]   ;;  %v801_v43 = vld [vmem:[%s1071_s7 + $0x8] sm:$0xff]  }
  0x17   : > { %v329_v0 = vld [vmem:[%s327_s25] sm:$0xff]  ;;  %735 = vmatpush3.bf16.msra.mxu1 %v797_v23  ;;  %s813_s25 = scalar_lea.vmem %s631_s17, 128 }
  0x18   : > { %v331_v1 = vsel %vm330_vm0, %v329_v0, 0.0  ;;  %v334_v2 = vmul.f32 %v329_v0, %v329_v0  ;;  %736 = vmatprep.subr.bf16.mxu1 %v875_v5  ;;  %v697_v27 = vld [vmem:[%s1068_s4] ss:$0 sm:$0xff]  ;;  %p814_p11 = scmp.ne.s32.totalorder %s631_s17, %s813_s25  ;;  %p821_p1 = scmp.lt.s32.totalorder %s819_s13, %s813_s25 }
  0x19   : > { %332 = vadd.xlane.f32.xlu0 %v331_v1  ;;  %729 = vmatpush3.bf16.msra.mxu0 %v796_v6  ;;  %v802_v44 = vld [vmem:[%s1071_s7] sm:$0xff]  }
  0x1a   : > { %v335_v3 = vsel %vm330_vm0, %v334_v2, 0.0  ;;  %746 = vmatprep.subr.bf16.mxu0 %v875_v5  ;;  %v701_v45 = vld [vmem:[%s1070_s6] ss:$0 sm:$0xff]  ;;  %p815_p12 = pnand %p814_p11, %p966_p5  ;;  %p822_p2 = por %p821_p1, %p820_p0 }
  0x1b   : > { %737 = vmatpush3.bf16.msra.mxu1 %v798_v24  ;;  %v707_v62 = vld [vmem:[%s1072_s8] ss:$0 sm:$0xff] }
  0x1c   : > { %738 = vmatprep.subr.bf16.mxu1 %v875_v5  ;;  %p816_p13 = pneg %p815_p12 }
  0x1d   : > { %336 = vadd.xlane.f32.xlu0 %v335_v3 }
  0x1e   : > { %p823_p3 = pnand %p822_p2, %p816_p13 }
  0x1f   : > { %739 = vmatpush3.bf16.msra.mxu1 %v799_v25 }
  0x20   : > { %740 = vmatprep.subr.bf16.mxu1 %v875_v5 }
  0x23   : > { %741 = vmatpush3.bf16.msra.mxu1 %v800_v26 }
  0xa2   : > { %v333_v7 = vpop.xlane.xlu0 %332 }
  0xa3   : > { %v338_v8 = vmul.f32 0.03125, %v333_v7 }
  0xa5   : > { %v340_v10 = vmul.f32 %v338_v8, %v338_v8  ;;  %v343_v15 = vsub.f32 %v329_v0, %v338_v8 }
  0xa6   : > { %v337_v9 = vpop.xlane.xlu0 %336 }
  0xa7   : > { %v339_v11 = vmul.f32 0.03125, %v337_v9 }
  0xa9   : > { %v341_v12 = vsub.f32 %v339_v11, %v340_v10 }
  0xab   : > { %v342_v13 = vmax.f32 %v341_v12, 0.0 }
  0xad   : > { %v344_v14 = vadd.f32 1e-05, %v342_v13 }
  0xaf   : > { %803 = vrsqrt.f32 %v344_v14 }
  0xbc   : > { %v804_v16 = vpop.eup %803 }
  0xbd   : > { %v346_v18 = vmul.f32 %v804_v16, %v343_v15 }
  0xbf   : > { %v354_v20 = vmul.f32 %v695_v17, %v346_v18 }
  0xc1   : > { %v362_v21 = vadd.f32 %v696_v19, %v354_v20 }
  0xc3   : > { %v363_v22 = vpack.c.bf16 %v362_v21, %v362_v21 }
  0xc5   : > { %731 = vmatmul.mubr.msk.bf16.vlgmr.msra.gmra.mxu0 %vm330_vm0, %v363_v22 }
  0xc6   : > { %750 = vmatprep.mubr.msk.bf16.mxu0 %vm876_vm1, %v875_v5  ;;  %747 = vmatpush3.bf16.msra.mxu0 %v801_v43 }
  0xc7   : > { %748 = vmatprep.subr.bf16.mxu0 %v875_v5 }
  0xca   : > { %749 = vmatpush3.bf16.msra.mxu0 %v802_v44 }
 0x185   : > { %v424_v28 = vpop.f32.mrf.mxu0 }
 0x186   : > { %v425_v29 = vadd.f32 %v697_v27, %v424_v28 }
 0x187   : > { %v732_v30 = vpop.f32.mrf.mxu0 }
 0x188   : > { %v430_v31 = vmul.f32 %v425_v29, %v425_v29 }
 0x189   : > { %v427_v32 = vpop.f32.mrf.mxu0 }
 0x18a   : > { %v431_v33 = vmul.f32 %v430_v31, %v425_v29 }
 0x18b   : > { %v733_v34 = vpop.f32.mrf.mxu0 }
 0x18c   : > { %v432_v35 = vmul.f32 0.044715, %v431_v33 }
 0x18e   : > { %v433_v36 = vadd.f32 %v432_v35, %v425_v29 }
 0x190   : > { %v434_v37 = vmul.f32 0.7978846, %v433_v36 }
 0x192   : > { %805 = vtanh.f32 %v434_v37 }
 0x19f   : > { %v806_v38 = vpop.eup %805 }
 0x1a0   : > { %v436_v39 = vadd.f32 1.0, %v806_v38 }
 0x1a2   : > { %v437_v40 = vmul.f32 0.5, %v436_v39 }
 0x1a4   : > { %v438_v41 = vmul.f32 %v437_v40, %v425_v29 }
 0x1a6   : > { %v439_v42 = vpack.c.bf16 %v438_v41, %v438_v41 }
 0x1a8   : > { %743 = vmatmul.mubr.msk.bf16.vlgmr.msra.gmra.mxu1 %vm479_vm2, %v439_v42 }
 0x268   : > { %v517_v46 = vpop.f32.mrf.mxu1 }
 0x269   : > { %v518_v47 = vadd.f32 %v701_v45, %v517_v46 }
 0x26a   : > { %v744_v48 = vpop.f32.mrf.mxu1 }
 0x26b   : > { %v523_v49 = vmul.f32 %v518_v47, %v518_v47 }
 0x26c   : > { %v520_v50 = vpop.f32.mrf.mxu1 }
 0x26d   : > { %v524_v51 = vmul.f32 %v523_v49, %v518_v47 }
 0x26e   : > { %v745_v52 = vpop.f32.mrf.mxu1 }
 0x26f   : > { %v525_v53 = vmul.f32 0.044715, %v524_v51 }
 0x271   : > { %v526_v54 = vadd.f32 %v525_v53, %v518_v47 }
 0x273   : > { %v527_v55 = vmul.f32 0.7978846, %v526_v54 }
 0x275   : > { %807 = vtanh.f32 %v527_v55 }
 0x282   : > { %v808_v56 = vpop.eup %807 }
 0x283   : > { %v529_v57 = vadd.f32 1.0, %v808_v56 }
 0x285   : > { %v530_v58 = vmul.f32 0.5, %v529_v57 }
 0x287   : > { %v531_v59 = vmul.f32 %v530_v58, %v518_v47 }
 0x289   : > { %v532_v60 = vadd.f32 %v531_v59, %v362_v21 }
 0x28b   : > { %v533_v61 = vpack.c.bf16 %v532_v60, %v532_v60 }
 0x28d   : > { %751 = vmatmul.mubr.msk.bf16.vlgmr.msra.gmra.mxu0 %vm330_vm0, %v533_v61 }
 0x34d   : > { %v594_v63 = vpop.f32.mrf.mxu0 }
 0x34e   : > { %v595_v0 = vadd.f32 %v707_v62, %v594_v63 }
 0x34f   : > { %v752_v1 = vpop.f32.mrf.mxu0 }
 0x350   : > { %v601_v2 = vsel %vm600_vm3, %v595_v0, -inf }
 0x351   : > { %602 = vmax.xlane.f32.xlu1 %v601_v2  ;;  %v597_v3 = vpop.f32.mrf.mxu0 }
 0x353   : > { %v753_v4 = vpop.f32.mrf.mxu0 }
 0x3da   : > { %v603_v5 = vpop.xlane.xlu1 %602 }
 0x3db   : > { %v604_v6 = vsub.f32 %v595_v0, %v603_v5 }
 0x3dd   : > { %v605_v7 = vmul.f32 1.442695, %v604_v6 }
 0x3df   : > { %809 = vpow2.f32 %v605_v7 }
 0x3ec   : > { %v810_v8 = vpop.eup %809 }
 0x3ed   : > { %v607_v9 = vsel %vm600_vm3, %v810_v8, 0.0 }
 0x3ee   : > { %608 = vadd.xlane.f32.xlu1 %v607_v9 }
 0x477   : > { %v609_v10 = vpop.xlane.xlu1 %608 }
 0x478   : > { %811 = vrcp.f32 %v609_v10 }
 0x485   : > { %v812_v11 = vpop.eup %811 }
 0x486   : > { %v611_v12 = vmul.f32 %v812_v11, %v609_v10 }
 0x488   : > { %v612_v13 = vsub.f32 2.0, %v611_v12 }
 0x48a   : > { %v613_v14 = vmul.f32 %v812_v11, %v612_v13 }
 0x48c   : > { %v614_v15 = vmul.f32 %v810_v8, %v613_v14 }
 0x48e   : > { %615 = vst.msk [vmem:[%s323_s16] sm:$0xff] %vm600_vm3, %v614_v15 }
 0x48f   : > { %826 = shalt.err (!%p823_p3)
}
 0x490   : > { %s827_s29 = scalar_lea.hbm %s628_s23, 128  ;;  %s831_s16 = scalar_lea.hbm %s1073_s9, 256 }
 0x491   : > { %p828_p4 = scmp.ne.s32.totalorder %s628_s23, %s827_s29  ;;  %p832_p9 = scmp.lt.s32.totalorder %s628_s23, %s1073_s9 }
 0x492   : > { %p833_p10 = scmp.lt.s32.totalorder %s831_s16, %s827_s29 }
 0x493   : > { %p829_p7 = pnand %p828_p4, %p966_p5 }
 0x494   : > { %p834_p11 = por %p833_p10, %p832_p9 }
 0x495   : > { %p830_p8 = pneg %p829_p7 }
 0x497   : > { %p835_p12 = pnand %p834_p11, %p830_p8 }
 0x499   : > { %838 = shalt.err (!%p835_p12)
}
 0x49a   : > { %754 = dma.vmem_to_hbm [thread:$0]  (%p966_p5), %s631_s17, 128, %s628_s23, %s617_s24  }
 0x49b PF: > { %p760_p13 = scmp.ge.s32.totalorder %s873_s12, 2  ;;  %s642_s25 = sand.u32 1, %s861_s30  }
 0x49c   : > { %s643_s26 = scalar_lea.sflag [#allocation3], %s642_s25 }
 0x49d   : > { %p757_p0 = pnand %p760_p13, %p970_p6 }
 0x49f   : > { %p758_p1 = pneg %p757_p0 }
 0x4a1   : > { %856 = dma.done.wait (%p758_p1), %s643_s26, 128  }
 0x4a2   : > { %858 = vsyncadd (%p758_p1), %s643_s26, 4294967168  ;;  %p19_p2 = scmp.ge.s32.totalorder %s953_s15, 4   ;;  %s1076_s30 = smov %s865_s10 }
 0x4a3   : > { %s1077_s10 = smov %s869_s11  ;;  %s1078_s11 = smov %s964_s18 }
 0x4a4   : > { %s1079_s12 = smov %s953_s15  ;;  %21 = sbr.rel (!%p19_p2) target bundleno = 3 (0x3), region = 91 }
 0x4a9   :  { %648 = vsyncpa [#allocation3], 1 }
 0x4aa   :  { %650 = vsyncpa [#allocation3 + $0x1], 1 }

</bundles_post_ra>
